<compile_context>
chip_gen: v6e
topology: v6e:2x2x1
jax: 0.10.0
libtpu: 0.0.40
codegen_flags: <defaults>
</compile_context>

<pallas_src>
import math

import jax
import jax.numpy as jnp
from jax import lax
from jax.experimental import pallas as pl
from jax.experimental.pallas import tpu as pltpu


# ---------------------------------------------------------------------------
# Tile-size / compiler-param helpers
# ---------------------------------------------------------------------------
_ROW_TILES = (512, 256, 128, 64, 32, 16, 8)   # sublane axis: multiples of 8
_COL_TILES = (512, 384, 256, 128)             # lane axis:    multiples of 128


def _pick_tile(dim, candidates, align):
    """Largest candidate tile <= dim that is `align`-aligned.  Ragged edges
    are handled by Pallas block clamping (safe for row / output-col axes)."""
    for c in candidates:
        if c <= dim and c % align == 0:
            return c
    return dim  # full dimension is always a legal block


def _pick_tile_exact(dim, candidates, align):
    """Like _pick_tile but the tile must divide `dim` exactly.  Used for
    contraction axes where out-of-bounds garbage would be accumulated."""
    for c in candidates:
        if c <= dim and dim % c == 0 and c % align == 0:
            return c
    return dim


def _pick_kv_tile(m, cap=1024):
    """Largest multiple-of-8 divisor of M up to `cap`.  The softmax must never
    see out-of-bounds K/V rows, so the tile has to divide M exactly."""
    if m <= cap:
        return m
    for t in range(cap, 7, -8):
        if m % t == 0:
            return t
    return m  # TODO(synk): ragged M would need explicit score masking.


def _itemsize(dt):
    return jnp.dtype(dt).itemsize


def _compiler_params(semantics, est_bytes):
    """Explicit scoped-VMEM limit: beat the 16/32 MiB defaults, keep headroom
    under the v7x 64 MiB physical cap whenever the working set allows it."""
    limit = max(32 << 20, min(56 << 20, 2 * est_bytes + (4 << 20)))
    limit = max(limit, est_bytes + (4 << 20))   # never below the working set
    return pltpu.CompilerParams(dimension_semantics=semantics,
                                vmem_limit_bytes=int(limit))


# ---------------------------------------------------------------------------
# Kernel 1: tiled linear projection  y = x @ W (+ bias), f32 accumulation
# ---------------------------------------------------------------------------
def _linear_kernel(x_ref, w_ref, o_ref, acc_ref):
    @pl.when(pl.program_id(2) == 0)
    def _init():
        acc_ref[...] = jnp.zeros_like(acc_ref)

    acc_ref[...] += jnp.dot(x_ref[...], w_ref[...],
                            preferred_element_type=jnp.float32)

    @pl.when(pl.program_id(2) == pl.num_programs(2) - 1)
    def _done():
        o_ref[...] = acc_ref[...].astype(o_ref.dtype)


def _linear_bias_kernel(x_ref, w_ref, b_ref, o_ref, acc_ref):
    @pl.when(pl.program_id(2) == 0)
    def _init():
        acc_ref[...] = jnp.zeros_like(acc_ref)

    acc_ref[...] += jnp.dot(x_ref[...], w_ref[...],
                            preferred_element_type=jnp.float32)

    @pl.when(pl.program_id(2) == pl.num_programs(2) - 1)
    def _done():
        o_ref[...] = (acc_ref[...] + b_ref[...]).astype(o_ref.dtype)


def linear(x2d, w, b=None, out_dtype=None):
    """x2d: (R, Din), w: (Din, Dout), b: (1, Dout) f32 or None -> (R, Dout)."""
    R, K = x2d.shape
    K2, N = w.shape
    assert K == K2
    out_dtype = out_dtype or x2d.dtype

    tm = _pick_tile(R, _ROW_TILES, 8)
    tn = _pick_tile(N, _COL_TILES, 128)
    tk = _pick_tile_exact(K, _COL_TILES, 128)     # contraction: exact tiles
    grid = (pl.cdiv(R, tm), pl.cdiv(N, tn), K // tk)

    x_spec = pl.BlockSpec((tm, tk), lambda i, j, k: (i, k))
    w_spec = pl.BlockSpec((tk, tn), lambda i, j, k: (k, j))
    o_spec = pl.BlockSpec((tm, tn), lambda i, j, k: (i, j))
    scratch = [pltpu.VMEM((tm, tn), jnp.float32)]

    isz, osz = _itemsize(x2d.dtype), _itemsize(out_dtype)
    est = (2 * tm * tk * isz + 2 * tk * tn * isz + 2 * tm * tn * osz
           + tm * tn * 4 + (2 * tn * 4 if b is not None else 0))
    cp = _compiler_params(("parallel", "parallel", "arbitrary"), est)
    out_shape = jax.ShapeDtypeStruct((R, N), out_dtype)

    if b is None:
        return pl.pallas_call(
            _linear_kernel,
            out_shape=out_shape,
            grid_spec=pltpu.PrefetchScalarGridSpec(
                num_scalar_prefetch=0, grid=grid,
                in_specs=[x_spec, w_spec], out_specs=o_spec,
                scratch_shapes=scratch),
            compiler_params=cp,
        )(x2d, w)

    b_spec = pl.BlockSpec((1, tn), lambda i, j, k: (0, j))
    return pl.pallas_call(
        _linear_bias_kernel,
        out_shape=out_shape,
        grid_spec=pltpu.PrefetchScalarGridSpec(
            num_scalar_prefetch=0, grid=grid,
            in_specs=[x_spec, w_spec, b_spec], out_specs=o_spec,
            scratch_shapes=scratch),
        compiler_params=cp,
    )(x2d, w, b)


# ---------------------------------------------------------------------------
# Kernel 2: fused K/V projection -- context is read from HBM exactly once
# ---------------------------------------------------------------------------
def _kv_proj_kernel(x_ref, wk_ref, wv_ref, k_out, v_out, acc_k, acc_v):
    @pl.when(pl.program_id(2) == 0)
    def _init():
        acc_k[...] = jnp.zeros_like(acc_k)
        acc_v[...] = jnp.zeros_like(acc_v)

    x = x_ref[...]
    acc_k[...] += jnp.dot(x, wk_ref[...], preferred_element_type=jnp.float32)
    acc_v[...] += jnp.dot(x, wv_ref[...], preferred_element_type=jnp.float32)

    @pl.when(pl.program_id(2) == pl.num_programs(2) - 1)
    def _done():
        k_out[...] = acc_k[...].astype(k_out.dtype)
        v_out[...] = acc_v[...].astype(v_out.dtype)


def kv_projection(x2d, w_k, w_v, out_dtype=None):
    """x2d: (R, Dc); w_k, w_v: (Dc, inner) -> (k2d, v2d), each (R, inner)."""
    R, K = x2d.shape
    _, N = w_k.shape
    out_dtype = out_dtype or x2d.dtype

    tm = _pick_tile(R, _ROW_TILES, 8)
    tn = _pick_tile(N, _COL_TILES, 128)      # tiled accumulators (v7x budget)
    tk = _pick_tile_exact(K, _COL_TILES, 128)
    grid = (pl.cdiv(R, tm), pl.cdiv(N, tn), K // tk)

    x_spec = pl.BlockSpec((tm, tk), lambda i, j, k: (i, k))
    w_spec = pl.BlockSpec((tk, tn), lambda i, j, k: (k, j))
    o_spec = pl.BlockSpec((tm, tn), lambda i, j, k: (i, j))

    isz, osz = _itemsize(x2d.dtype), _itemsize(out_dtype)
    est = (2 * tm * tk * isz + 4 * tk * tn * isz
           + 4 * tm * tn * osz + 2 * tm * tn * 4)
    cp = _compiler_params(("parallel", "parallel", "arbitrary"), est)

    return pl.pallas_call(
        _kv_proj_kernel,
        out_shape=(jax.ShapeDtypeStruct((R, N), out_dtype),
                   jax.ShapeDtypeStruct((R, N), out_dtype)),
        grid_spec=pltpu.PrefetchScalarGridSpec(
            num_scalar_prefetch=0, grid=grid,
            in_specs=[x_spec, w_spec, w_spec],
            out_specs=[o_spec, o_spec],
            scratch_shapes=[pltpu.VMEM((tm, tn), jnp.float32),
                            pltpu.VMEM((tm, tn), jnp.float32)]),
        compiler_params=cp,
    )(x2d, w_k, w_v)


# ---------------------------------------------------------------------------
# Kernel 3: flash-style dual-softmax attention core.
#   grid = (B * head_groups [parallel], M_tiles [arbitrary]); the running
#   softmax state (m, l, PV-acc) lives in VMEM scratch, so the full (N, M)
#   scores never materialize.  Heads are carved straight out of the
#   (B, N, h*d) projection layout via the BlockSpec index maps.
# ---------------------------------------------------------------------------
def _head_group(heads, dim_head):
    """Smallest head-group G (dividing `heads`) with a 128-lane-dense block."""
    for g in range(1, heads + 1):
        if heads % g == 0 and (g * dim_head) % 128 == 0:
            return g
    return heads  # full inner dim -> block equals full last dim (always legal)


def _make_flash_attn_kernel(G, d, approx_recip):
    def kernel(q_ref, q2_ref, k_ref, v_ref, o_ref, m_ref, l_ref, acc_ref):
        mi = pl.program_id(1)

        @pl.when(mi == 0)
        def _init():
            m_ref[...] = jnp.full_like(m_ref, -jnp.inf)
            l_ref[...] = jnp.zeros_like(l_ref)
            acc_ref[...] = jnp.zeros_like(acc_ref)

        k_all = k_ref[0]   # (tM, G*d)
        v_all = v_ref[0]   # (tM, G*d)

        # q / q2 share K,V; each (query-set, head) pair keeps its own online
        # softmax state.  Softmax scale is already folded into the weights.
        for s, q_all in enumerate((q_ref[0], q2_ref[0])):      # (N, G*d)
            for i in range(G):
                j = s * G + i
                sl = slice(i * d, (i + 1) * d)
                sc = lax.dot_general(
                    q_all[:, sl], k_all[:, sl],
                    dimension_numbers=(((1,), (1,)), ((), ())),
                    preferred_element_type=jnp.float32)          # (N, tM)
                m_prev = m_ref[j]                                 # (N, 1)
                m_new = jnp.maximum(m_prev,
                                    jnp.max(sc, axis=-1, keepdims=True))
                alpha = jnp.exp(m_prev - m_new)
                p = jnp.exp(sc - m_new)                           # (N, tM)
                l_ref[j] = alpha * l_ref[j] + jnp.sum(p, axis=-1, keepdims=True)
                acc_ref[j] = alpha * acc_ref[j] + jnp.dot(
                    p.astype(v_all.dtype), v_all[:, sl],
                    preferred_element_type=jnp.float32)           # (N, d)
                m_ref[j] = m_new

        @pl.when(mi == pl.num_programs(1) - 1)
        def _fin():
            # 0.5 mix weight folded into the (EUP) reciprocal; one lane-dense
            # store per block (per-head pieces concatenated only once, here).
            outs = []
            for i in range(G):
                inv1 = 0.5 * pl.reciprocal(l_ref[i], approx=approx_recip)
                inv2 = 0.5 * pl.reciprocal(l_ref[G + i], approx=approx_recip)
                outs.append(acc_ref[i] * inv1 + acc_ref[G + i] * inv2)
            out = outs[0] if G == 1 else jnp.concatenate(outs, axis=-1)
            o_ref[0] = out.astype(o_ref.dtype)

    return kernel


def dual_softmax_attention(q, q2, k, v, heads, dim_head, approx_recip=True):
    """q, q2: (B, N, h*d) pre-scaled; k, v: (B, M, h*d) -> (B, N, h*d)."""
    B, N, inner = q.shape
    M = k.shape[1]
    G = _head_group(heads, dim_head)
    gd = G * dim_head
    n_groups = heads // G
    tM = _pick_kv_tile(M)
    n_mt = M // tM

    # Batch and head-group flattened into one parallel axis (megacore-friendly
    # even at B=1); M tiles are the "arbitrary" accumulation axis.
    q_spec = pl.BlockSpec(
        (1, N, gd), lambda bg, mi: (bg // n_groups, 0, bg % n_groups))
    kv_spec = pl.BlockSpec(
        (1, tM, gd), lambda bg, mi: (bg // n_groups, mi, bg % n_groups))
    o_spec = pl.BlockSpec(
        (1, N, gd), lambda bg, mi: (bg // n_groups, 0, bg % n_groups))

    qsz = _itemsize(q.dtype)
    est = (2 * 2 * N * gd * qsz              # q, q2 blocks (double-buffered)
           + 2 * 2 * tM * gd * qsz           # k, v blocks (double-buffered)
           + 2 * N * gd * qsz                # output block
           + 2 * G * N * (2 * 128 + max(dim_head, 128)) * 4  # m, l, acc scratch
           + 4 * N * tM * 4)                 # score / exp temporaries
    cp = _compiler_params(("parallel", "arbitrary"), est)

    return pl.pallas_call(
        _make_flash_attn_kernel(G, dim_head, approx_recip),
        out_shape=jax.ShapeDtypeStruct((B, N, inner), q.dtype),
        grid_spec=pltpu.PrefetchScalarGridSpec(
            num_scalar_prefetch=0,
            grid=(B * n_groups, n_mt),
            in_specs=[q_spec, q_spec, kv_spec, kv_spec],
            out_specs=o_spec,
            scratch_shapes=[
                pltpu.VMEM((2 * G, N, 1), jnp.float32),         # running max
                pltpu.VMEM((2 * G, N, 1), jnp.float32),         # running sum
                pltpu.VMEM((2 * G, N, dim_head), jnp.float32),  # running PV acc
            ]),
        compiler_params=cp,
    )(q, q2, k, v)


# ---------------------------------------------------------------------------
# Module wrapper
# ---------------------------------------------------------------------------
class AttentionPallas:
    def __init__(self, key, query_dim=512, context_dim=512, heads=4,
                 dim_head=64, compute_dtype=jnp.float32,
                 approx_softmax_recip=True):
        inner_dim = dim_head * heads
        self.heads = heads
        self.dim_head = dim_head
        self.inner_dim = inner_dim
        self.scale = dim_head ** (-0.5)
        self.compute_dtype = compute_dtype
        self.approx_softmax_recip = approx_softmax_recip

        k1, k2, k3, k4, k5, k6 = jax.random.split(key, 6)

        def init_w(k, fan_in, fan_out):
            # deterministic, Kaiming-uniform-like init; stored as (in, out)
            bound = 1.0 / math.sqrt(fan_in)
            return jax.random.uniform(
                k, (fan_in, fan_out), jnp.float32, -bound, bound)

        # f32 master weights (used by the pure-JAX reference)
        self.w_q = init_w(k1, query_dim, inner_dim)
        self.w_q2 = init_w(k2, query_dim, inner_dim)
        self.w_k = init_w(k3, context_dim, inner_dim)
        self.w_v = init_w(k4, context_dim, inner_dim)
        self.w_out = init_w(k5, inner_dim, query_dim)
        bound = 1.0 / math.sqrt(inner_dim)
        self.b_out = jax.random.uniform(
            k6, (1, query_dim), jnp.float32, -bound, bound)

        # Compute-dtype copies.  The softmax scale is folded into the f32
        # master Q/Q2 weights *before* the cast: no in-kernel scale multiply
        # and no extra bf16 rounding of the scaled Q.
        cd = compute_dtype
        self.cw_q = (self.w_q * self.scale).astype(cd)
        self.cw_q2 = (self.w_q2 * self.scale).astype(cd)
        self.cw_k = self.w_k.astype(cd)
        self.cw_v = self.w_v.astype(cd)
        self.cw_out = self.w_out.astype(cd)

    def __call__(self, x1, x2, context, mask=None):
        # TODO(synk): mask is accepted but never applied -- this matches the
        # reference forward, which also ignores it.
        B, N, Dq = x1.shape
        _, M, Dc = context.shape
        h, d, inner = self.heads, self.dim_head, self.inner_dim
        cd = self.compute_dtype

        x1c = x1.astype(cd).reshape(B * N, Dq)
        x2c = x2.astype(cd).reshape(B * N, Dq)
        ctx = context.astype(cd).reshape(B * M, Dc)

        # Tiled, pipelined projections (scale pre-folded into cw_q / cw_q2).
        q = linear(x1c, self.cw_q, out_dtype=cd).reshape(B, N, inner)
        q2 = linear(x2c, self.cw_q2, out_dtype=cd).reshape(B, N, inner)
        # K and V fused: context is read from HBM once.
        k2d, v2d = kv_projection(ctx, self.cw_k, self.cw_v, out_dtype=cd)
        k = k2d.reshape(B, M, inner)
        v = v2d.reshape(B, M, inner)

        # Flash-style dual-softmax attention; head split/merge happens inside
        # the BlockSpec index maps (no HBM transpose round trips).
        out = dual_softmax_attention(q, q2, k, v, h, d,
                                     approx_recip=self.approx_softmax_recip)

        # Output projection with bias (f32 accumulation, f32 output).
        out = linear(out.reshape(B * N, inner), self.cw_out, self.b_out,
                     out_dtype=jnp.float32)
        return out.reshape(B, N, Dq)


# ---------------------------------------------------------------------------
# Pure-JAX reference for sanity checking.
# ---------------------------------------------------------------------------
def reference_forward(m: AttentionPallas, x1, x2, context):
    B, N, Dq = x1.shape
    M = context.shape[1]
    h, d = m.heads, m.dim_head
    inner = h * d

    q = x1 @ m.w_q
    q2 = x2 @ m.w_q2
    k = context @ m.w_k
    v = context @ m.w_v

    def sh(t, n):
        return t.reshape(B, n, h, d).transpose(0, 2, 1, 3).reshape(B * h, n, d)

    q, q2, k, v = sh(q, N), sh(q2, N), sh(k, M), sh(v, M)
    sim = jnp.einsum("bid,bjd->bij", q, k) * m.scale
    sim2 = jnp.einsum("bid,bjd->bij", q2, k) * m.scale
    attn = 0.5 * jax.nn.softmax(sim, -1) + 0.5 * jax.nn.softmax(sim2, -1)
    out = jnp.einsum("bij,bjd->bid", attn, v)
    out = out.reshape(B, h, N, d).transpose(0, 2, 1, 3).reshape(B, N, inner)
    return out @ m.w_out + m.b_out[0]


if __name__ == "__main__":
    key = jax.random.PRNGKey(0)
    k_param, k_x1, k_x2, k_ctx = jax.random.split(key, 4)

    # Small, module-consistent shapes: B=2, N=8 queries, M=8 context tokens,
    # query_dim=context_dim=32, heads=4, dim_head=8 (inner_dim=32).
    B, N, M = 2, 8, 8
    query_dim = context_dim = 32
    heads, dim_head = 4, 8

    x1 = jax.random.normal(k_x1, (B, N, query_dim), jnp.float32)
    x2 = jax.random.normal(k_x2, (B, N, query_dim), jnp.float32)
    context = jax.random.normal(k_ctx, (B, M, context_dim), jnp.float32)

    # f32 compute path (default), checked against the pure-JAX reference.
    module = AttentionPallas(
        k_param, query_dim=query_dim, context_dim=context_dim,
        heads=heads, dim_head=dim_head, compute_dtype=jnp.float32)
    out = jax.block_until_ready(module(x1, x2, context))
    ref = reference_forward(module, x1, x2, context)
    assert out.shape == (B, N, query_dim)
    assert jnp.allclose(out, ref, atol=1e-2, rtol=1e-2), \
        f"max abs err = {float(jnp.max(jnp.abs(out - ref)))}"

    # bf16-input path (v6e/v7x MXU optimization; f32 accumulation throughout).
    module_bf16 = AttentionPallas(
        k_param, query_dim=query_dim, context_dim=context_dim,
        heads=heads, dim_head=dim_head, compute_dtype=jnp.bfloat16)
    out_bf16 = jax.block_until_ready(module_bf16(x1, x2, context))
    assert out_bf16.shape == (B, N, query_dim)
    assert jnp.allclose(out_bf16, ref, atol=6e-2, rtol=6e-2), \
        f"max abs err (bf16) = {float(jnp.max(jnp.abs(out_bf16 - ref)))}"

    print("KERNEL_OK")
</pallas_src>

<mosaic_0001>
module attributes {stable_mosaic.version = 11 : i64} {
  func.func @_linear_kernel(%arg0: i32, %arg1: i32, %arg2: i32, %arg3: memref<16x32xf32, #tpu.memory_space<vmem>>, %arg4: memref<32x32xf32, #tpu.memory_space<vmem>>, %arg5: memref<16x32xf32, #tpu.memory_space<vmem>>, %arg6: memref<16x32xf32, #tpu.memory_space<vmem>>) attributes {dimension_semantics = [#tpu.dimension_semantics<parallel>, #tpu.dimension_semantics<parallel>, #tpu.dimension_semantics<arbitrary>], iteration_bounds = array<i64: 1, 1, 1>, scalar_prefetch = 0 : i64, scratch_operands = 1 : i64, tpu.core_type = #tpu.core_type<tc>, window_params = [{transform_indices = @transform_0, window_bounds = array<i64: 16, 32>}, {transform_indices = @transform_1, window_bounds = array<i64: 32, 32>}, {transform_indices = @transform_2, window_bounds = array<i64: 16, 32>}]} {
    %c0_i32 = arith.constant 0 : i32
    %0 = arith.cmpi eq, %arg2, %c0_i32 : i32
    %1 = arith.extui %0 : i1 to i32
    %c0_i32_0 = arith.constant 0 : i32
    %2 = arith.cmpi ne, %1, %c0_i32_0 : i32
    scf.if %2 {
      %cst_10 = arith.constant 0.000000e+00 : f32
      %12 = vector.broadcast %cst_10 : f32 to vector<16x32xf32>
      %c0_11 = arith.constant 0 : index
      %c0_12 = arith.constant 0 : index
      %13 = vector.load %arg6[%c0_11, %c0_12] : memref<16x32xf32, #tpu.memory_space<vmem>>, vector<16x32xf32>
      tpu.vector_store %arg6[%c0_11, %c0_12], %12 {strides = array<i32>} : memref<16x32xf32, #tpu.memory_space<vmem>>, vector<16x32xf32>,
    } else {
    }
    %c0 = arith.constant 0 : index
    %c0_1 = arith.constant 0 : index
    %3 = vector.load %arg6[%c0, %c0_1] : memref<16x32xf32, #tpu.memory_space<vmem>>, vector<16x32xf32>
    %c0_2 = arith.constant 0 : index
    %c0_3 = arith.constant 0 : index
    %4 = vector.load %arg3[%c0_2, %c0_3] : memref<16x32xf32, #tpu.memory_space<vmem>>, vector<16x32xf32>
    %c0_4 = arith.constant 0 : index
    %c0_5 = arith.constant 0 : index
    %5 = vector.load %arg4[%c0_4, %c0_5] : memref<32x32xf32, #tpu.memory_space<vmem>>, vector<32x32xf32>
    %cst = arith.constant dense<0.000000e+00> : vector<16x32xf32>
    %6 = tpu.matmul %4, %5, %cst {dimension_numbers = #tpu.dot_dimension_numbers<[1], [0], [0], [1], [0, 0, 1, 1], [], []>} : vector<16x32xf32>, vector<32x32xf32>, vector<16x32xf32> -> vector<16x32xf32>
    %7 = arith.addf %3, %6 : vector<16x32xf32>
    %c0_6 = arith.constant 0 : index
    %c0_7 = arith.constant 0 : index
    %8 = vector.load %arg6[%c0_6, %c0_7] : memref<16x32xf32, #tpu.memory_space<vmem>>, vector<16x32xf32>
    tpu.vector_store %arg6[%c0_6, %c0_7], %7 {strides = array<i32>} : memref<16x32xf32, #tpu.memory_space<vmem>>, vector<16x32xf32>,
    %c0_i32_8 = arith.constant 0 : i32
    %9 = arith.cmpi eq, %arg2, %c0_i32_8 : i32
    %10 = arith.extui %9 : i1 to i32
    %c0_i32_9 = arith.constant 0 : i32
    %11 = arith.cmpi ne, %10, %c0_i32_9 : i32
    scf.if %11 {
      %c0_10 = arith.constant 0 : index
      %c0_11 = arith.constant 0 : index
      %12 = vector.load %arg6[%c0_10, %c0_11] : memref<16x32xf32, #tpu.memory_space<vmem>>, vector<16x32xf32>
      %c0_12 = arith.constant 0 : index
      %c0_13 = arith.constant 0 : index
      %13 = vector.load %arg5[%c0_12, %c0_13] : memref<16x32xf32, #tpu.memory_space<vmem>>, vector<16x32xf32>
      tpu.vector_store %arg5[%c0_12, %c0_13], %12 {strides = array<i32>} : memref<16x32xf32, #tpu.memory_space<vmem>>, vector<16x32xf32>,
    } else {
    }
    return
  }
  func.func @transform_0(%arg0: i32, %arg1: i32, %arg2: i32) -> (i32, i32) {
    %c0_i32 = arith.constant 0 : i32
    return %arg0, %arg2 : i32, i32
  }
  func.func @transform_1(%arg0: i32, %arg1: i32, %arg2: i32) -> (i32, i32) {
    %c0_i32 = arith.constant 0 : i32
    return %arg2, %arg1 : i32, i32
  }
  func.func @transform_2(%arg0: i32, %arg1: i32, %arg2: i32) -> (i32, i32) {
    %c0_i32 = arith.constant 0 : i32
    return %arg0, %arg1 : i32, i32
  }
}

</mosaic_0001>

<bundles_post_ra>
// kernel: tpu_custom_call.1
= control target key start
LH: loop header
LB: loop body
LE: loop exit
PB: predicated region body
PF: predicated region fallthrough
CT: control target
= control target key end

     0   :  { %7 = vsyncpa [#allocation4], 0  ;;  %s304_s0 = inlined_call_operand.hbm [shape: f32[16,32], index: 0, kind: input, shape index: {}]   ;;  %s305_s1 = inlined_call_operand.hbm [shape: f32[32,32], index: 1, kind: input, shape index: {}]   ;;  %s306_s2 = inlined_call_operand.hbm [shape: f32[16,32], index: 2, kind: output, shape index: {}]  }
   0x1   :  { %8 = vsyncpa [#allocation7], 0 }
   0x2   :  { %9 = vsyncpa [#allocation5], 0  ;;  %s257_s9 = smov [#allocation3]  }
   0x3   :  { %s15_s10 = sshll.u32 %s257_s9, 4  ;;  %s16_s10 = int_to_ptr.vmem [resolvable:$true] %s15_s10 }
   0x4   :  { %s199_s11 = scalar_lea.vmem %s16_s10, 256  ;;  %p204_p1 = scmp.lt.s32.totalorder %s16_s10, %s16_s10 }
   0x5   :  { %p200_p0 = scmp.ne.s32.totalorder %s16_s10, %s199_s11  ;;  %p205_p2 = scmp.lt.s32.totalorder %s199_s11, %s199_s11 }
   0x7   :  { %p206_p3 = por %p205_p2, %p204_p1 }
   0x9   :  { %p207_p4 = pnand %p206_p3, %p200_p0 }
   0xb   :  { %210 = shalt.err (!%p207_p4)
}
   0xc   :  { %s258_s12 = smov 128   ;;  %s259_s13 = smov 8  }
   0xd   :  { %21 = dma.hbm_to_vmem [thread:$0]  %s304_s0, 256, %s16_s10, [#allocation4], %s258_s12, %s258_s12, %s259_s13  }
   0xe   :  { %s260_s16 = smov [#allocation6]  }
   0xf   :  { %s27_s17 = sshll.u32 %s260_s16, 4  ;;  %s28_s17 = int_to_ptr.vmem [resolvable:$true] %s27_s17 }
  0x10   :  { %s219_s18 = scalar_lea.vmem %s28_s17, 512  ;;  %p224_p6 = scmp.lt.s32.totalorder %s28_s17, %s28_s17 }
  0x11   :  { %p220_p5 = scmp.ne.s32.totalorder %s28_s17, %s219_s18  ;;  %p225_p7 = scmp.lt.s32.totalorder %s219_s18, %s219_s18 }
  0x13   :  { %p226_p8 = por %p225_p7, %p224_p6 }
  0x15   :  { %p227_p9 = pnand %p226_p8, %p220_p5 }
  0x17   :  { %230 = shalt.err (!%p227_p9)
}
  0x18   :  { %33 = dma.hbm_to_vmem [thread:$0]  %s305_s1, 512, %s28_s17, [#allocation7], %s258_s12, %s258_s12, %s259_s13  }
  0x19   :  { %251 = dma.done.wait [#allocation4], 256  }
  0x1a   :  { %252 = vsyncadd [#allocation4], 4294967040 }
  0x1b   :  { %253 = dma.done.wait [#allocation7], 512  }
  0x1c   :  { %254 = vsyncadd [#allocation7], 4294966784  ;;  %vm44_vm0 = vcmask 261120   ;;  %v261_v0 = vmov 0.0   ;;  %v54_v1 = vld [vmem:[#allocation6 + $0x18] sm:$0xff]  ;;  %v53_v2 = vld [vmem:[#allocation6 + $0x10] sm:$0xff] }
  0x1d   :  { %46 = vst.msk [vmem:[#allocation2 + $0x8] sm:$0xff] %vm44_vm0, %v261_v0  ;;  %45 = vst.msk [vmem:[#allocation2] sm:$0xff] %vm44_vm0, %v261_v0  ;;  %174 = vmatprep.subr.mxu0 %v54_v1  ;;  %v49_v3 = vld [vmem:[#allocation3] sm:$0xff]  ;;  %v52_v4 = vld [vmem:[#allocation6 + $0x8] sm:$0xff]  ;;  %s262_s0 = smov [#allocation8]  }
  0x1e   :  { %175 = vmatpush3.msra.mxu0 %v54_v1  ;;  %182 = vmatprep.mubr.msk.f32.mxu0 %vm44_vm0, %v49_v3  ;;  %v51_v5 = vld [vmem:[#allocation6] sm:$0xff]  ;;  %v50_v6 = vld [vmem:[#allocation3 + $0x8] sm:$0xff]  ;;  %s153_s1 = sshll.u32 %s262_s0, 4  ;;  %s154_s1 = int_to_ptr.vmem [resolvable:$true] %s153_s1 }
  0x1f   :  { %176 = vmatprep.subr.mxu0 %v53_v2  ;;  %s231_s21 = scalar_lea.vmem %s154_s1, 256  ;;  %p236_p11 = scmp.lt.s32.totalorder %s154_s1, %s154_s1 }
  0x20   :  { %177 = vmatpush3.msra.mxu0 %v53_v2  ;;  %p232_p10 = scmp.ne.s32.totalorder %s154_s1, %s231_s21  ;;  %p237_p12 = scmp.lt.s32.totalorder %s231_s21, %s231_s21 }
  0x21   :  { %178 = vmatprep.subr.mxu0 %v52_v4 }
  0x22   :  { %179 = vmatpush3.msra.mxu0 %v52_v4  ;;  %p238_p13 = por %p237_p12, %p236_p11 }
  0x23   :  { %180 = vmatprep.subr.mxu0 %v51_v5 }
  0x24   :  { %181 = vmatpush3.msra.mxu0 %v51_v5  ;;  %v48_v7 = vld [vmem:[#allocation2 + $0x8] sm:$0xff]  ;;  %v47_v9 = vld [vmem:[#allocation2] sm:$0xff]  ;;  %p239_p0 = pnand %p238_p13, %p232_p10 }
  0x25   :  { %183 = vmatmul.mubr.msk.f32.vlgmr.msra.gmra.mxu0 %vm44_vm0, %v50_v6 }
  0xe5   :  { %v184_v8 = vpop.f32.mrf.mxu0 }
  0xe6   :  { %v138_v10 = vadd.f32 %v184_v8, %v48_v7 }
  0xe7   :  { %v128_v11 = vpop.f32.mrf.mxu0 }
  0xe8   :  { %140 = vst.msk [vmem:[#allocation2 + $0x8] sm:$0xff] %vm44_vm0, %v138_v10  ;;  %v137_v12 = vadd.f32 %v128_v11, %v47_v9 }
  0xea   :  { %139 = vst.msk [vmem:[#allocation2] sm:$0xff] %vm44_vm0, %v137_v12 }
  0xef   :  { %v145_v13 = vld [vmem:[#allocation2 + $0x8] sm:$0xff] }
  0xf0   :  { %147 = vst.msk [vmem:[#allocation8 + $0x8] sm:$0xff] %vm44_vm0, %v145_v13 }
  0xf1   :  { %v144_v14 = vld [vmem:[#allocation2] sm:$0xff] }
  0xf2   :  { %146 = vst.msk [vmem:[#allocation8] sm:$0xff] %vm44_vm0, %v144_v14 }
  0xf3   :  { %242 = shalt.err (!%p239_p0)
}
  0xf4   :  { %159 = dma.vmem_to_hbm [thread:$0]  %s154_s1, 256, %s306_s2, [#allocation5], %s258_s12, %s258_s12, %s259_s13  }
  0xf5   :  { %255 = dma.done.wait [#allocation5], 256  }
  0xf6   :  { %256 = vsyncadd [#allocation5], 4294967040 }
  0xf7   :  { %163 = vsyncpa [#allocation4], 1 }
  0xf8   :  { %164 = vsyncpa [#allocation7], 1 }
  0xf9   :  { %165 = vsyncpa [#allocation5], 1 }

</bundles_post_ra>
